<compile_context>
chip_gen: v5e
topology: v5e:2x2
jax: 0.10.0
libtpu: 0.0.40
codegen_flags: <defaults>
</compile_context>

<pallas_src>
import numpy as np
import jax
import jax.numpy as jnp
from jax.experimental import pallas as pl
from jax.experimental.pallas import tpu as pltpu


def build_pix_xy(height, width):
    """Rows [x, y] of the module's pix_coords buffer (the ones row is folded in-kernel)."""
    xx, yy = np.meshgrid(np.arange(width), np.arange(height), indexing="xy")
    pix_xy = np.stack([xx.reshape(-1), yy.reshape(-1)], axis=0).astype(np.float32)  # (2, N)
    return jnp.asarray(pix_xy)


def _choose_tile(n, max_tile=8192):
    """Largest lane tile <= max_tile that is a multiple of 128 and divides n (else full n)."""
    if n <= max_tile:
        return n
    t = (max_tile // 128) * 128
    while t >= 128:
        if n % t == 0:
            return t
        t -= 128
    return n


def _backproject_kernel(depth_ref, invk_ref, pix_ref, out_ref):
    # depth_ref: (1, 1, TN)   invk_ref: (1, 3, 3)   pix_ref: (2, TN)   out_ref: (1, 4, TN)
    A = invk_ref[0]                     # (3, 3) upper-left of inv_K
    px = pix_ref[0:1, :]                # (1, TN)
    py = pix_ref[1:2, :]                # (1, TN)
    d = depth_ref[0]                    # (1, TN)
    # rays = A @ [x; y; 1]  as VPU broadcast-MACs (no MXU for a K=3 contraction).
    rays = A[:, 0:1] * px + A[:, 1:2] * py + A[:, 2:3]       # (3, TN)
    out_ref[0, 0:3, :] = d * rays                            # depth-scaled cam points
    out_ref[0, 3:4, :] = jnp.ones_like(d)                    # homogeneous ones row


def backproject_depth_forward(depth, inv_K, pix_xy, batch_size, height, width,
                              max_tile=8192):
    """depth: (B,1,H,W) or (B,H,W); inv_K: (B,4,4); returns cam_points (B,4,H*W)."""
    B = batch_size
    N = height * width
    depth_flat = depth.reshape(B, 1, N).astype(jnp.float32)
    inv_K3 = inv_K[:, :3, :3].astype(jnp.float32)            # hoisted tiny slice (B,3,3)
    pix_xy = pix_xy.astype(jnp.float32)                      # (2, N), batch-constant

    TN = _choose_tile(N, max_tile)
    n_tiles = N // TN if N % TN == 0 else 1
    if N % TN != 0:
        TN = N

    out = pl.pallas_call(
        _backproject_kernel,
        out_shape=jax.ShapeDtypeStruct((B, 4, N), jnp.float32),
        grid_spec=pltpu.PrefetchScalarGridSpec(
            num_scalar_prefetch=0,
            # n outer, b inner: the pix block index is unchanged across the inner
            # batch loop, so the batch-constant pix tile is not re-DMA'd per batch.
            grid=(n_tiles, B),
            in_specs=[
                pl.BlockSpec((1, 1, TN), lambda n, b: (b, 0, n)),   # depth
                pl.BlockSpec((1, 3, 3), lambda n, b: (b, 0, 0)),    # inv_K[:, :3, :3]
                pl.BlockSpec((2, TN), lambda n, b: (0, n)),         # pix_xy (shared)
            ],
            out_specs=pl.BlockSpec((1, 4, TN), lambda n, b: (b, 0, n)),
        ),
        compiler_params=pltpu.CompilerParams(
            dimension_semantics=("parallel", "parallel")),
        cost_estimate=pl.CostEstimate(
            flops=15 * B * N,
            transcendentals=0,
            bytes_accessed=(4 + 16) * B * N + 8 * N + 36 * B,
        ),
    )(depth_flat, inv_K3, pix_xy)
    return out


def _reference_forward(depth, inv_K, pix_xy, batch_size, height, width):
    """Pure-JAX reference mirroring the PyTorch forward exactly (full 3-row pix_coords)."""
    B = batch_size
    N = height * width
    ones = jnp.ones((1, N), dtype=jnp.float32)
    pix_full = jnp.concatenate([pix_xy, ones], axis=0)               # (3, N)
    pix_full_b = jnp.broadcast_to(pix_full[None], (B, 3, N))          # module's .repeat
    cam = jnp.einsum("bij,bjn->bin", inv_K[:, :3, :3], pix_full_b)    # (B, 3, N)
    cam = depth.reshape(B, 1, N) * cam
    ones_b = jnp.ones((B, 1, N), dtype=jnp.float32)
    return jnp.concatenate([cam, ones_b], axis=1)                     # (B, 4, N)


if __name__ == "__main__":
    batch_size = 2
    height = 16
    width = 16
    N = height * width

    pix_xy = build_pix_xy(height, width)

    key = jax.random.PRNGKey(0)
    # Positive depth map, (B, 1, H, W) as in typical usage of this module.
    depth = 0.1 + jax.random.uniform(key, (batch_size, 1, height, width),
                                     dtype=jnp.float32) * 10.0

    # Deterministic plausible inverse intrinsics, slightly different per batch element.
    inv_Ks = []
    for b in range(batch_size):
        K = np.eye(4, dtype=np.float64)
        K[0, 0] = 0.58 * width * (1.0 + 0.01 * b)    # fx
        K[1, 1] = 1.92 * height * (1.0 + 0.01 * b)   # fy
        K[0, 2] = 0.5 * width                        # cx
        K[1, 2] = 0.5 * height                       # cy
        inv_Ks.append(np.linalg.inv(K))
    inv_K = jnp.asarray(np.stack(inv_Ks).astype(np.float32))          # (B, 4, 4)

    out = backproject_depth_forward(depth, inv_K, pix_xy, batch_size, height, width)
    out = jax.block_until_ready(out)

    ref = _reference_forward(depth, inv_K, pix_xy, batch_size, height, width)
    assert out.shape == (batch_size, 4, N), out.shape
    np.testing.assert_allclose(np.asarray(out), np.asarray(ref), rtol=1e-5, atol=1e-5)

    print("KERNEL_OK")
</pallas_src>

<mosaic_0001>
module attributes {stable_mosaic.version = 11 : i64} {
  func.func @_backproject_kernel(%arg0: i32, %arg1: i32, %arg2: memref<1x1x256xf32, #tpu.memory_space<vmem>>, %arg3: memref<1x3x3xf32, #tpu.memory_space<vmem>>, %arg4: memref<2x256xf32, #tpu.memory_space<vmem>>, %arg5: memref<1x4x256xf32, #tpu.memory_space<vmem>>) attributes {dimension_semantics = [#tpu.dimension_semantics<parallel>, #tpu.dimension_semantics<parallel>], iteration_bounds = array<i64: 1, 2>, scalar_prefetch = 0 : i64, scratch_operands = 0 : i64, tpu.core_type = #tpu.core_type<tc>, window_params = [{transform_indices = @transform_0, window_bounds = array<i64: 1, 1, 256>}, {transform_indices = @transform_1, window_bounds = array<i64: 1, 3, 3>}, {transform_indices = @transform_2, window_bounds = array<i64: 2, 256>}, {transform_indices = @transform_3, window_bounds = array<i64: 1, 4, 256>}]} {
    %c0 = arith.constant 0 : index
    %c0_0 = arith.constant 0 : index
    %c0_1 = arith.constant 0 : index
    %0 = vector.load %arg3[%c0, %c0_0, %c0_1] : memref<1x3x3xf32, #tpu.memory_space<vmem>>, vector<1x3x3xf32>
    %1 = vector.shape_cast %0 : vector<1x3x3xf32> to vector<3x3xf32>
    %c0_2 = arith.constant 0 : index
    %c0_3 = arith.constant 0 : index
    %2 = vector.load %arg4[%c0_2, %c0_3] : memref<2x256xf32, #tpu.memory_space<vmem>>, vector<1x256xf32>
    %c1 = arith.constant 1 : index
    %c0_4 = arith.constant 0 : index
    %3 = vector.load %arg4[%c1, %c0_4] : memref<2x256xf32, #tpu.memory_space<vmem>>, vector<1x256xf32>
    %c0_5 = arith.constant 0 : index
    %c0_6 = arith.constant 0 : index
    %c0_7 = arith.constant 0 : index
    %4 = vector.load %arg2[%c0_5, %c0_6, %c0_7] : memref<1x1x256xf32, #tpu.memory_space<vmem>>, vector<1x1x256xf32>
    %5 = vector.shape_cast %4 : vector<1x1x256xf32> to vector<1x256xf32>
    %6 = vector.extract_strided_slice %1 {offsets = [0, 0], sizes = [3, 1], strides = [1, 1]} : vector<3x3xf32> to vector<3x1xf32>
    %7 = vector.broadcast %6 : vector<3x1xf32> to vector<3x256xf32>
    %8 = vector.broadcast %2 : vector<1x256xf32> to vector<3x256xf32>
    %9 = arith.mulf %7, %8 : vector<3x256xf32>
    %10 = vector.extract_strided_slice %1 {offsets = [0, 1], sizes = [3, 1], strides = [1, 1]} : vector<3x3xf32> to vector<3x1xf32>
    %11 = vector.broadcast %10 : vector<3x1xf32> to vector<3x256xf32>
    %12 = vector.broadcast %3 : vector<1x256xf32> to vector<3x256xf32>
    %13 = arith.mulf %11, %12 : vector<3x256xf32>
    %14 = arith.addf %9, %13 : vector<3x256xf32>
    %15 = vector.extract_strided_slice %1 {offsets = [0, 2], sizes = [3, 1], strides = [1, 1]} : vector<3x3xf32> to vector<3x1xf32>
    %16 = vector.broadcast %15 : vector<3x1xf32> to vector<3x256xf32>
    %17 = arith.addf %14, %16 : vector<3x256xf32>
    %18 = vector.broadcast %5 : vector<1x256xf32> to vector<3x256xf32>
    %19 = arith.mulf %18, %17 : vector<3x256xf32>
    %c0_8 = arith.constant 0 : index
    %c0_9 = arith.constant 0 : index
    %c0_10 = arith.constant 0 : index
    %20 = vector.load %arg5[%c0_8, %c0_9, %c0_10] : memref<1x4x256xf32, #tpu.memory_space<vmem>>, vector<1x3x256xf32>
    %21 = vector.shape_cast %20 : vector<1x3x256xf32> to vector<3x256xf32>
    %22 = vector.shape_cast %19 : vector<3x256xf32> to vector<1x3x256xf32>
    tpu.vector_store %arg5[%c0_8, %c0_9, %c0_10], %22 {strides = array<i32>} : memref<1x4x256xf32, #tpu.memory_space<vmem>>, vector<1x3x256xf32>,
    %cst = arith.constant 1.000000e+00 : f32
    %23 = vector.broadcast %cst : f32 to vector<1x256xf32>
    %c0_11 = arith.constant 0 : index
    %c3 = arith.constant 3 : index
    %c0_12 = arith.constant 0 : index
    %24 = vector.load %arg5[%c0_11, %c3, %c0_12] : memref<1x4x256xf32, #tpu.memory_space<vmem>>, vector<1x1x256xf32>
    %25 = vector.shape_cast %24 : vector<1x1x256xf32> to vector<1x256xf32>
    %26 = vector.shape_cast %23 : vector<1x256xf32> to vector<1x1x256xf32>
    tpu.vector_store %arg5[%c0_11, %c3, %c0_12], %26 {strides = array<i32>} : memref<1x4x256xf32, #tpu.memory_space<vmem>>, vector<1x1x256xf32>,
    return
  }
  func.func @transform_0(%arg0: i32, %arg1: i32) -> (i32, i32, i32) {
    %c0_i32 = arith.constant 0 : i32
    %c0_i32_0 = arith.constant 0 : i32
    return %arg1, %c0_i32, %arg0 : i32, i32, i32
  }
  func.func @transform_1(%arg0: i32, %arg1: i32) -> (i32, i32, i32) {
    %c0_i32 = arith.constant 0 : i32
    %c0_i32_0 = arith.constant 0 : i32
    %c0_i32_1 = arith.constant 0 : i32
    return %arg1, %c0_i32, %c0_i32_0 : i32, i32, i32
  }
  func.func @transform_2(%arg0: i32, %arg1: i32) -> (i32, i32) {
    %c0_i32 = arith.constant 0 : i32
    %c0_i32_0 = arith.constant 0 : i32
    return %c0_i32, %arg0 : i32, i32
  }
  func.func @transform_3(%arg0: i32, %arg1: i32) -> (i32, i32, i32) {
    %c0_i32 = arith.constant 0 : i32
    %c0_i32_0 = arith.constant 0 : i32
    return %arg1, %c0_i32, %arg0 : i32, i32, i32
  }
}

</mosaic_0001>

<bundles_post_ra>
// kernel: tpu_custom_call.1
= control target key start
LH: loop header
LB: loop body
LE: loop exit
PB: predicated region body
PF: predicated region fallthrough
CT: control target
= control target key end

     0   :  { %8 = vsyncpa [#allocation3], 0  ;;  %s710_s0 = inlined_call_operand.vmem [shape: f32[2,1,256], index: 0, kind: input, shape index: {}]   ;;  %s711_s1 = inlined_call_operand.vmem [shape: f32[2,3,3], index: 1, kind: input, shape index: {}]   ;;  %s712_s2 = inlined_call_operand.vmem [shape: f32[2,256], index: 2, kind: input, shape index: {}]   ;;  %s713_s3 = inlined_call_operand.hbm [shape: f32[2,4,256], index: 3, kind: output, shape index: {}]  }
   0x1   :  { %10 = vsyncpa [#allocation3 + $0x1], 0  ;;  %s595_s12 = smov 0   ;;  %s597_s13 = smov 0  }
   0x2   :  { %s599_s14 = smov 0   ;;  %s601_s15 = smov 0  }
   0x3   :  { %s603_s16 = smov 0   ;;  %s605_s17 = smov 0  }
   0x4 LB: > { %s411_s18 = sadd.s32 4294967295, %s569_s17   ;;  %s412_s19 = sadd.s32 4294967294, %s569_s17   ;;  %s569_s17 = sphi %s605_s17, %s16_s17   ;;  %s565_s16 = sphi %s603_s16, %s720_s16   ;;  %s561_s15 = sphi %s601_s15, %s719_s15   ;;  %s557_s14 = sphi %s599_s14, %s718_s14   ;;  %s553_s13 = sphi %s597_s13, %s717_s13   ;;  %s549_s12 = sphi %s595_s12, %s716_s12  }
   0x5   : > { %s25_s20 = sadd.s32 1, %s565_s16  ;;  %s117_s21 = sadd.s32 1, %s557_s14 }
   0x6   : > { %p26_p0 = scmp.ge.s32.totalorder %s25_s20, 2  ;;  %p127_p1 = scmp.ne.s32.totalorder %s557_s14, %s553_s13 }
   0x7   : > { %p128_p2 = scmp.eq.s32.totalorder %s411_s18, 1  ;;  %p133_p3 = scmp.ne.s32.totalorder %s553_s13, %s549_s12 }
   0x8   : > { %s722_s20 = smov (%p26_p0, %s25_s20), 0  ;;  %p134_p5 = scmp.eq.s32.totalorder %s412_s19, 1 }
   0x9   : > { %p635_p4 = por %p128_p2, %p127_p1  ;;  %s112_s23 = ssub.s32 %s565_s16, %s722_s20 }
   0xa   : > { %p416_p6 = scmp.ge.s32.totalorder %s569_s17, 1  ;;  %p115_p7 = scmp.eq.s32.totalorder %s112_s23, 0 }
   0xb   : > { %p642_p8 = por %p134_p5, %p133_p3  ;;  %p180_p9 = scmp.lt.s32.totalorder %s569_s17, 3 }
   0xc   : > { %s648_s25 = scalar_select %p115_p7, %s557_s14, %s117_s21  }
   0xd   : > { %p181_p10 = pnand %p416_p6, %p180_p9 }
   0xe   : > { %p217_p11 = scmp.lt.s32.totalorder (!%p181_p10), %s561_s15, 1  ;;  %s213_s4 = sand.u32 (!%p181_p10), 1, %s553_s13  }
   0xf   : > { %184 = sbr.rel (%p181_p10) target bundleno = 163 (0xa3), region = 32  ;;  %s417_s5 = sshll.u32 (!%p181_p10), %s213_s4, 3 }
  0x10   : > { %s658_s6 = scalar_lea.vmem (!%p181_p10), [#allocation2], %s417_s5  ;;  %s427_s23 = sshll.u32 (!%p181_p10), %s561_s15, 3 }
  0x11   : > { %s306_s28 = scalar_lea.hbm (!%p181_p10), %s713_s3, %s427_s23  ;;  %s308_s29 = sshll.u32 (!%p181_p10), %s658_s6, 4  ;;  %s309_s29 = int_to_ptr.vmem [resolvable:$true] %s308_s29 }
  0x12   : > { %s511_s10 = scalar_lea.hbm (!%p181_p10), %s713_s3, 16 }
  0x14   : > { %v571_v0 = vmov 0   ;;  %v572_v1 = vmov 2   ;;  %s218_s26 = scalar_select %p217_p11, %s561_s15, 1  ;;  %v573_v3 = vmov 1   ;;  %v286_v4 = vlaneseq }
  0x15   : > { %487 = vset.pattern.permute.xlu0 %v571_v0  ;;  %489 = vset.pattern.permute.xlu1 %v572_v1  ;;  %v574_v5 = vmov 1.0   ;;  %v237_v7 = vld [vmem:[%s712_s2] ss:$2 sm:$0x3]  ;;  %vm282_vm1 = vcmask 1043456   ;;  %s293_s15 = scalar_lea.sflag [#allocation3], %s213_s4 }
  0x16   : > { %s419_s27 = sshll.u32 %s218_s26, 2  ;;  %vm288_vm0 = vcmp.lt.s32.totalorder %v286_v4, 256  ;;  %v420_v8 = vld [vmem:[%s712_s2 + $0x1] ss:$2 sm:$0x3]  ;;  %s418_s11 = sshll.u32 %s218_s26, 1 }
  0x17   : > { %s228_s30 = scalar_lea.vmem %s711_s1, %s419_s27  ;;  %421 = vst.msk [vmem:[%s658_s6 + $0x3] ss:$4 sm:$0x3] %vm288_vm0, %v574_v5  ;;  %v247_v9 = vperm.slane %v237_v7, 0  ;;  %v248_v10 = vperm.slane %v237_v7, 1  ;;  %v258_v11 = vperm.slane %v420_v8, 0  ;;  %s223_s21 = scalar_lea.vmem %s710_s0, %s418_s11 }
  0x18   : > { %v236_v2 = vld [vmem:[%s228_s30] sm:$0x7]  ;;  %v259_v12 = vperm.slane %v420_v8, 1  ;;  %s310_s30 = sshll.u32 %s306_s28, 4  ;;  %s311_s30 = int_to_ptr.hbm [resolvable:$true] %s310_s30 }
  0x19   : > { %243 = vperm.xlu0 %487, %v236_v2   ;;  %267 = vperm.xlu1 %489, %v236_v2   ;;  %v240_v14 = vld [vmem:[%s223_s21] sm:$0x3]  ;;  %s505_s5 = sshra.s32 %s311_s30, 4  ;;  %s506_s5 = int_to_ptr.hbm [resolvable:$true] %s505_s5 }
  0x1a   : > { %v274_v22 = vperm.slane %v240_v14, 1  ;;  %v273_v25 = vperm.slane %v240_v14, 0  ;;  %s507_s7 = scalar_lea.hbm %s506_s5, 8  ;;  %p512_p1 = scmp.lt.s32.totalorder %s506_s5, %s713_s3 }
  0x1b   : > { %p508_p12 = scmp.ne.s32.totalorder %s506_s5, %s507_s7  ;;  %p513_p2 = scmp.lt.s32.totalorder %s511_s10, %s507_s7 }
  0x1d   : > { %p509_p13 = pnand %p508_p12, %p635_p4  ;;  %p514_p3 = por %p513_p2, %p512_p1 }
  0x1f   : > { %p510_p0 = pneg %p509_p13 }
  0x21   : > { %488 = vset.pattern.permute.xlu0 %v573_v3  ;;  %p515_p5 = pnand %p514_p3, %p510_p0 }
  0x22   : > { %254 = vperm.xlu0 %488, %v236_v2  }
  0x2a   : > { %490 = vset.pattern.permute.xlu0 %v572_v1 }
  0x8b   : > { %v244_v6 = vpop.permute.xlu0 %243  ;;  %v268_v19 = vpop.permute.xlu1 %267 }
  0x8c   : > { %v251_v15 = vmul.f32 %v247_v9, %v244_v6  ;;  %v252_v16 = vmul.f32 %v248_v10, %v244_v6 }
  0x94   : > { %v255_v13 = vpop.permute.xlu0 %254 }
  0x95   : > { %v262_v17 = vmul.f32 %v258_v11, %v255_v13  ;;  %v263_v18 = vmul.f32 %v259_v12, %v255_v13 }
  0x97   : > { %v264_v20 = vadd.f32 %v262_v17, %v251_v15  ;;  %v265_v21 = vadd.f32 %v263_v18, %v252_v16 }
  0x99   : > { %v270_v23 = vadd.f32 %v268_v19, %v264_v20  ;;  %v271_v24 = vadd.f32 %v268_v19, %v265_v21 }
  0x9b   : > { %v278_v26 = vmul.f32 %v274_v22, %v271_v24  ;;  %v277_v27 = vmul.f32 %v273_v25, %v270_v23 }
  0x9d   : > { %v281_v28 = vrot.slane %v278_v26, 4 }
  0x9f   : > { %v283_v29 = vsel %vm282_vm1, %v277_v27, %v281_v28 }
  0xa0   : > { %285 = vst [vmem:[%s658_s6] sm:$0x77] %v283_v29 }
  0xa1   : > { %518 = shalt.err (!%p515_p5)
}
  0xa2   : > { %428 = dma.vmem_to_hbm [thread:$0]  (%p635_p4), %s309_s29, 128, %s311_s30, %s293_s15  }
  0xa3 PF: > { %p434_p6 = scmp.ge.s32.totalorder %s569_s17, 2  ;;  %s322_s4 = sand.u32 1, %s549_s12  }
  0xa4   : > { %s323_s6 = scalar_lea.sflag [#allocation3], %s322_s4 }
  0xa5   : > { %p431_p7 = pnand %p434_p6, %p642_p8 }
  0xa7   : > { %p432_p9 = pneg %p431_p7 }
  0xa9   : > { %544 = dma.done.wait (%p432_p9), %s323_s6, 128  }
  0xaa   : > { %546 = vsyncadd (%p432_p9), %s323_s6, 4294967168  ;;  %s16_s17 = sadd.s32 1, %s569_s17   ;;  %s716_s12 = smov %s553_s13 }
  0xab   : > { %p13_p10 = scmp.ge.s32.totalorder %s16_s17, 4   ;;  %s717_s13 = smov %s557_s14 }
  0xac   : > { %s718_s14 = smov %s648_s25  ;;  %s719_s15 = smov %s565_s16 }
  0xad   : > { %s720_s16 = smov %s722_s20  ;;  %15 = sbr.rel (!%p13_p10) target bundleno = 4 (0x4), region = 75 }
  0xb2   :  { %329 = vsyncpa [#allocation3], 1 }
  0xb3   :  { %331 = vsyncpa [#allocation3 + $0x1], 1 }

</bundles_post_ra>
